<compile_context>
chip_gen: v6e
topology: v6e:2x2x1
jax: 0.10.0
libtpu: 0.0.40
codegen_flags: <defaults>
</compile_context>

<pallas_src>
import jax
import jax.numpy as jnp
from jax.experimental import pallas as pl
from jax.experimental.pallas import tpu as pltpu

# ---------------- problem sizes (small, consistent with the module) --------
B = 4            # batch (must be even: forward swaps batch halves)
C_IN = 4         # input channels
H = W = 16       # spatial
C_MID = 8        # encoder feature dim (resnet stand-in output)
HIDDEN = 32      # projection head hidden dim
PROJ = 16        # projection output dim
KH = KW = 3
KDIM = KH * KW * C_IN          # 36
KCOLS = KDIM + 1               # +1 all-ones column that carries the conv bias
HW = H * W                     # 256
BHW = B * HW                   # 1024

C_PAD = 128                    # lane-dense output width for all matmuls
ONES_LANE = C_PAD - 1          # carrier channel (== 1.0) for the MLP biases


# ---------------- fused Pallas kernel ---------------------------------------
def m_byol_fused_kernel(patches_ref, wc_ref, w1_ref, w2_ref, h_ref, z_ref):
    """conv-as-matmul -> ReLU -> avg-pool (sublane reduce) -> MLP -> half-swap."""
    # Conv over im2col patches: (BHW, 37)bf16 @ (37, 128)bf16 -> f32 on the MXU.
    # Conv bias lives in wc row KDIM (patches column KDIM is all ones).
    y = jnp.dot(patches_ref[...], wc_ref[...], preferred_element_type=jnp.float32)
    y = jnp.maximum(y, 0.0)                                   # ReLU in f32 (v5e-safe)

    # Global average pool: per-batch sublane reduce in f32 (keeps the 256-term
    # mean at full precision; XLU slot is otherwise idle).  Lane ONES_LANE of y
    # is exactly 1.0 everywhere, so hh[:, ONES_LANE] == 1.0 and carries the MLP
    # biases through the next two matmuls.
    hh = y.reshape(B, HW, C_PAD).sum(axis=1) * jnp.float32(1.0 / HW)   # (B, 128)
    h_ref[...] = hh

    # Projection MLP (Linear -> ReLU -> Linear); b1/b2 folded into row ONES_LANE.
    t = jnp.dot(hh.astype(jnp.bfloat16), w1_ref[...],
                preferred_element_type=jnp.float32)
    t = jnp.maximum(t, 0.0)                                   # ReLU in f32
    z = jnp.dot(t.astype(jnp.bfloat16), w2_ref[...],
                preferred_element_type=jnp.float32)

    # torch.cat([z[B//2:], z[:B//2]], dim=0).  Valid because the projection head
    # is strictly row-wise (no BatchNorm / cross-batch ops in this stand-in).
    z_ref[...] = jnp.concatenate([z[B // 2:, :], z[:B // 2, :]], axis=0)


# ---------------- wrapper-side glue -----------------------------------------
def im2col_patches_bf16(x_nchw):
    """NCHW -> (BHW, KDIM+1) bf16 patches for a 3x3 / stride-1 / pad-1 conv.

    K is left UNPADDED (the MXU pads the contraction internally); the extra
    last column is all ones and carries the conv bias.
    """
    x = jnp.transpose(x_nchw, (0, 2, 3, 1))                    # NHWC
    xp = jnp.pad(x, ((0, 0), (1, 1), (1, 1), (0, 0)))
    cols = [xp[:, dy:dy + H, dx:dx + W, :] for dy in range(KH) for dx in range(KW)]
    patches = jnp.concatenate(cols, axis=-1).reshape(BHW, KDIM)   # (BHW, 36)
    ones = jnp.ones((BHW, 1), patches.dtype)
    return jnp.concatenate([patches, ones], axis=-1).astype(jnp.bfloat16)


def init_params():
    key = jax.random.PRNGKey(0)
    k = jax.random.split(key, 6)
    # conv weight in PyTorch layout (C_out, C_in, kh, kw), flattened to
    # (kh*kw*C_in, C_out) matching the im2col (kh, kw, C_in) ordering.
    w_conv_t = jax.random.normal(k[0], (C_MID, C_IN, KH, KW), jnp.float32) * 0.1
    w_conv = jnp.transpose(w_conv_t, (2, 3, 1, 0)).reshape(KDIM, C_MID)
    b_conv = jax.random.normal(k[1], (1, C_MID), jnp.float32) * 0.1
    w1 = jax.random.normal(k[2], (C_MID, HIDDEN), jnp.float32) * 0.1
    b1 = jax.random.normal(k[3], (1, HIDDEN), jnp.float32) * 0.1
    w2 = jax.random.normal(k[4], (HIDDEN, PROJ), jnp.float32) * 0.1
    b2 = jax.random.normal(k[5], (1, PROJ), jnp.float32) * 0.1
    return w_conv, b_conv, w1, b1, w2, b2


def prepare_padded_params(params):
    """Pad/fold weights ONCE (hoisted out of the per-call path), cast to bf16.

    * wc  row KDIM      = conv bias     (patches' ones column multiplies it)
    * wc  [KDIM, 127]   = 1.0           -> y[:,127] == 1.0 survives ReLU + mean
    * w1  row ONES_LANE = b1, [127,127]=1.0  -> t[:,127] == 1.0 after ReLU
    * w2  row ONES_LANE = b2
    Padded lanes are zero so sliced outputs are exact.
    """
    w_conv, b_conv, w1, b1, w2, b2 = params
    wc_p = jnp.zeros((KCOLS, C_PAD), jnp.float32)
    wc_p = wc_p.at[:KDIM, :C_MID].set(w_conv)
    wc_p = wc_p.at[KDIM, :C_MID].set(b_conv[0])
    wc_p = wc_p.at[KDIM, ONES_LANE].set(1.0)

    w1_p = jnp.zeros((C_PAD, C_PAD), jnp.float32)
    w1_p = w1_p.at[:C_MID, :HIDDEN].set(w1)
    w1_p = w1_p.at[ONES_LANE, :HIDDEN].set(b1[0])
    w1_p = w1_p.at[ONES_LANE, ONES_LANE].set(1.0)

    w2_p = jnp.zeros((C_PAD, C_PAD), jnp.float32)
    w2_p = w2_p.at[:HIDDEN, :PROJ].set(w2)
    w2_p = w2_p.at[ONES_LANE, :PROJ].set(b2[0])

    return (wc_p.astype(jnp.bfloat16),
            w1_p.astype(jnp.bfloat16),
            w2_p.astype(jnp.bfloat16))


def m_byol_forward(images_nchw, padded_params):
    wc_p, w1_p, w2_p = padded_params
    patches = im2col_patches_bf16(images_nchw)                 # (BHW, 37) bf16

    flops = 2 * BHW * KCOLS * C_PAD + 2 * 2 * B * C_PAD * C_PAD
    bytes_accessed = (BHW * KCOLS * 2 + KCOLS * C_PAD * 2
                      + 2 * C_PAD * C_PAD * 2 + 2 * B * C_PAD * 4)

    vmem = pl.BlockSpec(memory_space=pltpu.MemorySpace.VMEM)
    h_pad, z_pad = pl.pallas_call(
        m_byol_fused_kernel,
        out_shape=(jax.ShapeDtypeStruct((B, C_PAD), jnp.float32),
                   jax.ShapeDtypeStruct((B, C_PAD), jnp.float32)),
        in_specs=[vmem, vmem, vmem, vmem],
        out_specs=(vmem, vmem),
        cost_estimate=pl.CostEstimate(flops=flops, transcendentals=0,
                                      bytes_accessed=bytes_accessed),
    )(patches, wc_p, w1_p, w2_p)

    m_h = h_pad[:, :C_MID]
    m_z = z_pad[:, :PROJ]
    # torch .detach() -> stop_gradient (no-op for the forward values)
    return m_h, jax.lax.stop_gradient(m_z)


def m_byol_reference(images_nchw, params):
    """Pure-JAX f32 reference (unpadded math) for correctness checking."""
    w_conv, b_conv, w1, b1, w2, b2 = params
    x = jnp.transpose(images_nchw, (0, 2, 3, 1))
    xp = jnp.pad(x, ((0, 0), (1, 1), (1, 1), (0, 0)))
    cols = [xp[:, dy:dy + H, dx:dx + W, :] for dy in range(KH) for dx in range(KW)]
    patches = jnp.concatenate(cols, axis=-1).reshape(B, HW, KDIM)
    y = jnp.maximum(jnp.einsum("bpk,kc->bpc", patches, w_conv) + b_conv[None], 0.0)
    h = jnp.mean(y, axis=1)
    t = jnp.maximum(h @ w1 + b1, 0.0)
    z = t @ w2 + b2
    half = z.shape[0] // 2
    z = jnp.concatenate([z[half:], z[:half]], axis=0)
    return h, z


if __name__ == "__main__":
    params = init_params()
    padded_params = prepare_padded_params(params)      # hoisted: padded once
    x = jax.random.normal(jax.random.PRNGKey(0), (B, C_IN, H, W), jnp.float32)

    fwd = jax.jit(m_byol_forward)
    m_h, m_z = jax.block_until_ready(fwd(x, padded_params))
    h_ref, z_ref = m_byol_reference(x, params)

    assert m_h.shape == (B, C_MID) and m_z.shape == (B, PROJ)
    # bf16 MXU feeds (f32 accumulation) vs. the f32 XLA reference: allow the
    # standard bf16 operand-rounding tolerance.
    assert jnp.allclose(m_h, h_ref, rtol=2e-2, atol=2e-2), "m_h mismatch"
    assert jnp.allclose(m_z, z_ref, rtol=2e-2, atol=2e-2), "m_z mismatch"
    print("KERNEL_OK")
</pallas_src>

<mosaic_0001>
module attributes {stable_mosaic.version = 11 : i64} {
  func.func @m_byol_fused_kernel(%arg0: memref<1024x37xbf16, #tpu.memory_space<vmem>>, %arg1: memref<37x128xbf16, #tpu.memory_space<vmem>>, %arg2: memref<128x128xbf16, #tpu.memory_space<vmem>>, %arg3: memref<128x128xbf16, #tpu.memory_space<vmem>>, %arg4: memref<4x128xf32, #tpu.memory_space<vmem>>, %arg5: memref<4x128xf32, #tpu.memory_space<vmem>>) attributes {dimension_semantics = [], scalar_prefetch = 0 : i64, scratch_operands = 0 : i64, tpu.core_type = #tpu.core_type<tc>} {
    %c0 = arith.constant 0 : index
    %c0_0 = arith.constant 0 : index
    %0 = vector.load %arg0[%c0, %c0_0] : memref<1024x37xbf16, #tpu.memory_space<vmem>>, vector<1024x37xbf16>
    %c0_1 = arith.constant 0 : index
    %c0_2 = arith.constant 0 : index
    %1 = vector.load %arg1[%c0_1, %c0_2] : memref<37x128xbf16, #tpu.memory_space<vmem>>, vector<37x128xbf16>
    %cst = arith.constant dense<0.000000e+00> : vector<1024x128xf32>
    %2 = tpu.matmul %0, %1, %cst {dimension_numbers = #tpu.dot_dimension_numbers<[1], [0], [0], [1], [0, 0, 1, 1], [], []>} : vector<1024x37xbf16>, vector<37x128xbf16>, vector<1024x128xf32> -> vector<1024x128xf32>
    %cst_3 = arith.constant 0.000000e+00 : f32
    %3 = vector.broadcast %cst_3 : f32 to vector<1024x128xf32>
    %4 = arith.maximumf %2, %3 : vector<1024x128xf32>
    %5 = vector.shape_cast %4 : vector<1024x128xf32> to vector<4x256x128xf32>
    %cst_4 = arith.constant dense<0.000000e+00> : vector<4x128xf32>
    %6 = vector.multi_reduction <add>, %5, %cst_4 [1] : vector<4x256x128xf32> to vector<4x128xf32>
    %cst_5 = arith.constant 3.906250e-03 : f32
    %7 = vector.broadcast %cst_5 : f32 to vector<4x128xf32>
    %8 = arith.mulf %6, %7 : vector<4x128xf32>
    %c0_6 = arith.constant 0 : index
    %c0_7 = arith.constant 0 : index
    %9 = vector.load %arg4[%c0_6, %c0_7] : memref<4x128xf32, #tpu.memory_space<vmem>>, vector<4x128xf32>
    tpu.vector_store %arg4[%c0_6, %c0_7], %8 {strides = array<i32>} : memref<4x128xf32, #tpu.memory_space<vmem>>, vector<4x128xf32>,
    %10 = arith.truncf %8 : vector<4x128xf32> to vector<4x128xbf16>
    %c0_8 = arith.constant 0 : index
    %c0_9 = arith.constant 0 : index
    %11 = vector.load %arg2[%c0_8, %c0_9] : memref<128x128xbf16, #tpu.memory_space<vmem>>, vector<128x128xbf16>
    %cst_10 = arith.constant dense<0.000000e+00> : vector<4x128xf32>
    %12 = tpu.matmul %10, %11, %cst_10 {dimension_numbers = #tpu.dot_dimension_numbers<[1], [0], [0], [1], [0, 0, 1, 1], [], []>} : vector<4x128xbf16>, vector<128x128xbf16>, vector<4x128xf32> -> vector<4x128xf32>
    %cst_11 = arith.constant 0.000000e+00 : f32
    %13 = vector.broadcast %cst_11 : f32 to vector<4x128xf32>
    %14 = arith.maximumf %12, %13 : vector<4x128xf32>
    %15 = arith.truncf %14 : vector<4x128xf32> to vector<4x128xbf16>
    %c0_12 = arith.constant 0 : index
    %c0_13 = arith.constant 0 : index
    %16 = vector.load %arg3[%c0_12, %c0_13] : memref<128x128xbf16, #tpu.memory_space<vmem>>, vector<128x128xbf16>
    %cst_14 = arith.constant dense<0.000000e+00> : vector<4x128xf32>
    %17 = tpu.matmul %15, %16, %cst_14 {dimension_numbers = #tpu.dot_dimension_numbers<[1], [0], [0], [1], [0, 0, 1, 1], [], []>} : vector<4x128xbf16>, vector<128x128xbf16>, vector<4x128xf32> -> vector<4x128xf32>
    %18 = vector.extract_strided_slice %17 {offsets = [2, 0], sizes = [2, 128], strides = [1, 1]} : vector<4x128xf32> to vector<2x128xf32>
    %19 = vector.extract_strided_slice %17 {offsets = [0, 0], sizes = [2, 128], strides = [1, 1]} : vector<4x128xf32> to vector<2x128xf32>
    %20 = tpu.concatenate %18, %19 in 0 : vector<2x128xf32>, vector<2x128xf32> -> vector<4x128xf32>
    %c0_15 = arith.constant 0 : index
    %c0_16 = arith.constant 0 : index
    %21 = vector.load %arg5[%c0_15, %c0_16] : memref<4x128xf32, #tpu.memory_space<vmem>>, vector<4x128xf32>
    tpu.vector_store %arg5[%c0_15, %c0_16], %20 {strides = array<i32>} : memref<4x128xf32, #tpu.memory_space<vmem>>, vector<4x128xf32>,
    return
  }
}

</mosaic_0001>

<bundles_post_ra>
// kernel: m_byol_forward.1
= control target key start
LH: loop header
LB: loop body
LE: loop exit
PB: predicated region body
PF: predicated region fallthrough
CT: control target
= control target key end

     0   :  { %11 = vsyncpa [#allocation3], 0  ;;  %vm683_vm0 = vcmask 1041408   ;;  %vm684_vm1 = vcmask 1042432   ;;  %v2333_v1 = vmov 65535   ;;  %vm490_vm2 = vcmask 302080   ;;  %s2784_s0 = inlined_call_operand.vmem [shape: bf16[1024,37], index: 0, kind: input, shape index: {}]   ;;  %s2785_s1 = inlined_call_operand.vmem [shape: bf16[37,128], index: 1, kind: input, shape index: {}]   ;;  %s2786_s2 = inlined_call_operand.vmem [shape: bf16[128,128], index: 2, kind: input, shape index: {}]   ;;  %s2787_s3 = inlined_call_operand.vmem [shape: bf16[128,128], index: 3, kind: input, shape index: {}]   ;;  %s2788_s4 = inlined_call_operand.hbm [shape: f32[4,128], index: 4, kind: output, shape index: {0}]   ;;  %s2789_s5 = inlined_call_operand.hbm [shape: f32[4,128], index: 5, kind: output, shape index: {1}]  }
   0x1   :  { %v2206_v0 = vld [vmem:[%s2785_s1 + $0x10] ss:$0 sps:$4 sm:$0x77]   ;;  %v685_v2 = vsel %vm683_vm0, 4294967295, %v2333_v1  ;;  %v2207_v4 = vld [vmem:[%s2785_s1 + $0x8] sm:$0xff]   ;;  %v2209_v6 = vld [vmem:[%s2784_s0] sm:$0xff]  }
   0x2   :  { %v686_v3 = vsel %vm684_vm1, %v685_v2, 0  ;;  %2027 = vmatprep.mubr.msk.bf16.mxu0 %vm490_vm2, %v2209_v6  ;;  %v2208_v7 = vld [vmem:[%s2785_s1] sm:$0xff]   ;;  %v2210_v8 = vld [vmem:[%s2784_s0 + $0x8] sm:$0xff]   ;;  %v2211_v9 = vld [vmem:[%s2784_s0 + $0x10] sm:$0xff]  }
   0x3   :  { %v688_v5 = vand.u32 %v2206_v0, %v686_v3  ;;  %v2212_v10 = vld [vmem:[%s2784_s0 + $0x18] sm:$0xff]   ;;  %v2213_v11 = vld [vmem:[%s2784_s0 + $0x20] sm:$0xff]   ;;  %v2229_v12 = vld [vmem:[%s2784_s0 + $0x130] sm:$0xff]  }
   0x4   :  { %v2230_v13 = vld [vmem:[%s2784_s0 + $0x138] sm:$0xff]   ;;  %2103 = vmatprep.mubr.msk.bf16.mxu1 %vm490_vm2, %v2229_v12  ;;  %v2233_v14 = vld [vmem:[%s2784_s0 + $0x140] sm:$0xff]   ;;  %v2214_v15 = vld [vmem:[%s2784_s0 + $0x28] sm:$0xff]  }
   0x5   :  { %2021 = vmatprep.subr.bf16.mxu0 %v688_v5  ;;  %2195 = vmatprep.subr.bf16.mxu1 %v688_v5  ;;  %v2215_v16 = vld [vmem:[%s2784_s0 + $0x30] sm:$0xff]   ;;  %v2234_v17 = vld [vmem:[%s2784_s0 + $0x148] sm:$0xff]   ;;  %v2216_v19 = vld [vmem:[%s2784_s0 + $0x38] sm:$0xff]  }
   0x6   :  { %2022 = vmatpush3.bf16.msra.mxu0 %v688_v5  ;;  %2198 = vmatpush3.bf16.msra.mxu1 %v688_v5  ;;  %v2237_v18 = vld [vmem:[%s2784_s0 + $0x150] sm:$0xff]   ;;  %v2217_v20 = vld [vmem:[%s2784_s0 + $0x40] sm:$0xff]   ;;  %v2238_v21 = vld [vmem:[%s2784_s0 + $0x158] sm:$0xff]  }
   0x7   :  { %2023 = vmatprep.subr.bf16.mxu0 %v2207_v4  ;;  %2196 = vmatprep.subr.bf16.mxu1 %v2207_v4  ;;  %v2241_v22 = vld [vmem:[%s2784_s0 + $0x160] sm:$0xff]   ;;  %v2218_v23 = vld [vmem:[%s2784_s0 + $0x48] sm:$0xff]   ;;  %v2219_v24 = vld [vmem:[%s2784_s0 + $0x50] sm:$0xff]  }
   0x8   :  { %v2242_v25 = vld [vmem:[%s2784_s0 + $0x168] sm:$0xff]   ;;  %v2245_v26 = vld [vmem:[%s2784_s0 + $0x170] sm:$0xff]   ;;  %v2220_v27 = vld [vmem:[%s2784_s0 + $0x58] sm:$0xff]  }
   0x9   :  { %v2221_v28 = vld [vmem:[%s2784_s0 + $0x60] sm:$0xff]   ;;  %v2246_v29 = vld [vmem:[%s2784_s0 + $0x178] sm:$0xff]   ;;  %v2222_v31 = vld [vmem:[%s2784_s0 + $0x68] sm:$0xff]  }
   0xa   :  { %2024 = vmatpush3.bf16.msra.mxu0 %v2207_v4  ;;  %2199 = vmatpush3.bf16.msra.mxu1 %v2207_v4  ;;  %v2249_v30 = vld [vmem:[%s2784_s0 + $0x180] sm:$0xff]   ;;  %v2223_v32 = vld [vmem:[%s2784_s0 + $0x70] sm:$0xff]   ;;  %v2250_v33 = vld [vmem:[%s2784_s0 + $0x188] sm:$0xff]  }
   0xb   :  { %2025 = vmatprep.subr.bf16.mxu0 %v2208_v7  ;;  %2197 = vmatprep.subr.bf16.mxu1 %v2208_v7  ;;  %v2253_v34 = vld [vmem:[%s2784_s0 + $0x190] sm:$0xff]   ;;  %v2224_v35 = vld [vmem:[%s2784_s0 + $0x78] sm:$0xff]   ;;  %v2225_v36 = vld [vmem:[%s2784_s0 + $0x80] sm:$0xff]  }
   0xc   :  { %v2254_v37 = vld [vmem:[%s2784_s0 + $0x198] sm:$0xff]   ;;  %v2257_v38 = vld [vmem:[%s2784_s0 + $0x1a0] sm:$0xff]   ;;  %v2226_v39 = vld [vmem:[%s2784_s0 + $0x88] sm:$0xff]  }
   0xe   :  { %2026 = vmatpush3.bf16.msra.mxu0 %v2208_v7  ;;  %2200 = vmatpush3.bf16.msra.mxu1 %v2208_v7 }
  0x11   :  { %2028 = vmatmul.mubr.msk.bf16.vlgmr.msra.gmra.mxu0 %vm490_vm2, %v2210_v8  ;;  %2104 = vmatmul.mubr.msk.bf16.vlgmr.msra.gmra.mxu1 %vm490_vm2, %v2230_v13 }
  0x12   :  { %2031 = vmatprep.mubr.msk.bf16.mxu0 %vm490_vm2, %v2211_v9  ;;  %2107 = vmatprep.mubr.msk.bf16.mxu1 %vm490_vm2, %v2233_v14 }
  0x19   :  { %2032 = vmatmul.mubr.msk.bf16.gmra.mxu0 %vm490_vm2, %v2212_v10  ;;  %2108 = vmatmul.mubr.msk.bf16.gmra.mxu1 %vm490_vm2, %v2234_v17 }
  0x1a   :  { %2035 = vmatprep.mubr.msk.bf16.mxu0 %vm490_vm2, %v2213_v11  ;;  %2111 = vmatprep.mubr.msk.bf16.mxu1 %vm490_vm2, %v2237_v18 }
  0x21   :  { %2036 = vmatmul.mubr.msk.bf16.gmra.mxu0 %vm490_vm2, %v2214_v15  ;;  %2112 = vmatmul.mubr.msk.bf16.gmra.mxu1 %vm490_vm2, %v2238_v21 }
  0x22   :  { %2039 = vmatprep.mubr.msk.bf16.mxu0 %vm490_vm2, %v2215_v16  ;;  %2115 = vmatprep.mubr.msk.bf16.mxu1 %vm490_vm2, %v2241_v22 }
  0x29   :  { %2040 = vmatmul.mubr.msk.bf16.gmra.mxu0 %vm490_vm2, %v2216_v19  ;;  %2116 = vmatmul.mubr.msk.bf16.gmra.mxu1 %vm490_vm2, %v2242_v25 }
  0x2a   :  { %2043 = vmatprep.mubr.msk.bf16.mxu0 %vm490_vm2, %v2217_v20  ;;  %2119 = vmatprep.mubr.msk.bf16.mxu1 %vm490_vm2, %v2245_v26 }
  0x31   :  { %2044 = vmatmul.mubr.msk.bf16.gmra.mxu0 %vm490_vm2, %v2218_v23  ;;  %2120 = vmatmul.mubr.msk.bf16.gmra.mxu1 %vm490_vm2, %v2246_v29 }
  0x32   :  { %2047 = vmatprep.mubr.msk.bf16.mxu0 %vm490_vm2, %v2219_v24  ;;  %2123 = vmatprep.mubr.msk.bf16.mxu1 %vm490_vm2, %v2249_v30 }
  0x39   :  { %2048 = vmatmul.mubr.msk.bf16.gmra.mxu0 %vm490_vm2, %v2220_v27  ;;  %2124 = vmatmul.mubr.msk.bf16.gmra.mxu1 %vm490_vm2, %v2250_v33 }
  0x3a   :  { %2051 = vmatprep.mubr.msk.bf16.mxu0 %vm490_vm2, %v2221_v28  ;;  %2127 = vmatprep.mubr.msk.bf16.mxu1 %vm490_vm2, %v2253_v34 }
  0x41   :  { %2052 = vmatmul.mubr.msk.bf16.gmra.mxu0 %vm490_vm2, %v2222_v31  ;;  %2128 = vmatmul.mubr.msk.bf16.gmra.mxu1 %vm490_vm2, %v2254_v37 }
  0x42   :  { %2055 = vmatprep.mubr.msk.bf16.mxu0 %vm490_vm2, %v2223_v32  ;;  %2131 = vmatprep.mubr.msk.bf16.mxu1 %vm490_vm2, %v2257_v38 }
  0x49   :  { %2056 = vmatmul.mubr.msk.bf16.gmra.mxu0 %vm490_vm2, %v2224_v35 }
  0x4a   :  { %2059 = vmatprep.mubr.msk.bf16.mxu0 %vm490_vm2, %v2225_v36 }
  0x4b   :  { %12 = vsyncpa [#allocation5], 0  ;;  %v2227_v40 = vld [vmem:[%s2784_s0 + $0x90] sm:$0xff]   ;;  %v2258_v41 = vld [vmem:[%s2784_s0 + $0x1a8] sm:$0xff]   ;;  %v2334_v8 = vmov 0.0   ;;  %vm2335_vm3 = vmmov 0  }
  0x4c   :  { %v2261_v42 = vld [vmem:[%s2784_s0 + $0x1b0] sm:$0xff]   ;;  %2132 = vmatmul.mubr.msk.bf16.gmra.mxu1 %vm490_vm2, %v2258_v41  ;;  %v2228_v43 = vld [vmem:[%s2784_s0 + $0x98] sm:$0xff]   ;;  %v2231_v44 = vld [vmem:[%s2784_s0 + $0xa0] sm:$0xff]   ;;  %2155 = vmatprep.subr.bf16.mxu1 %v2334_v8  ;;  %vm1519_vm4 = vcmask 1041409   ;;  %vm1521_vm5 = vcmask 1042434   ;;  %vm1523_vm6 = vcmask 1043459  }
  0x4d   :  { %2135 = vmatprep.mubr.msk.bf16.mxu1 %vm490_vm2, %v2261_v42  ;;  %v2262_v45 = vld [vmem:[%s2784_s0 + $0x1b8] sm:$0xff]   ;;  %v2265_v46 = vld [vmem:[%s2784_s0 + $0x1c0] sm:$0xff]   ;;  %v2232_v47 = vld [vmem:[%s2784_s0 + $0xa8] sm:$0xff]   ;;  %s2336_s25 = smov [#allocation2]  }
  0x4e   :  { %v2235_v48 = vld [vmem:[%s2784_s0 + $0xb0] sm:$0xff]   ;;  %v2266_v49 = vld [vmem:[%s2784_s0 + $0x1c8] sm:$0xff]   ;;  %v2236_v51 = vld [vmem:[%s2784_s0 + $0xb8] sm:$0xff]   ;;  %s1767_s26 = sshll.u32 %s2336_s25, 4  ;;  %s1768_s26 = int_to_ptr.vmem [resolvable:$true] %s1767_s26 }
  0x4f   :  { %v2267_v50 = vld [vmem:[%s2784_s0 + $0x1d0] sm:$0xff]   ;;  %v2239_v52 = vld [vmem:[%s2784_s0 + $0xc0] sm:$0xff]   ;;  %v2268_v53 = vld [vmem:[%s2784_s0 + $0x1d8] sm:$0xff]   ;;  %s2289_s27 = scalar_lea.vmem %s1768_s26, 64  ;;  %p2294_p1 = scmp.lt.s32.totalorder %s1768_s26, %s1768_s26 }
  0x50   :  { %v2269_v54 = vld [vmem:[%s2784_s0 + $0x1e0] sm:$0xff]   ;;  %v2240_v55 = vld [vmem:[%s2784_s0 + $0xc8] sm:$0xff]   ;;  %v2243_v56 = vld [vmem:[%s2784_s0 + $0xd0] sm:$0xff]   ;;  %p2290_p0 = scmp.ne.s32.totalorder %s1768_s26, %s2289_s27  ;;  %p2295_p2 = scmp.lt.s32.totalorder %s2289_s27, %s2289_s27 }
  0x51   :  { %2060 = vmatmul.mubr.msk.bf16.gmra.mxu0 %vm490_vm2, %v2226_v39  ;;  %v2270_v57 = vld [vmem:[%s2784_s0 + $0x1e8] sm:$0xff]   ;;  %v2271_v58 = vld [vmem:[%s2784_s0 + $0x1f0] sm:$0xff]   ;;  %v2244_v59 = vld [vmem:[%s2784_s0 + $0xd8] sm:$0xff]  }
  0x52   :  { %2063 = vmatprep.mubr.msk.bf16.mxu0 %vm490_vm2, %v2227_v40  ;;  %v2247_v60 = vld [vmem:[%s2784_s0 + $0xe0] sm:$0xff]   ;;  %v2272_v61 = vld [vmem:[%s2784_s0 + $0x1f8] sm:$0xff]   ;;  %v2248_v62 = vld [vmem:[%s2784_s0 + $0xe8] sm:$0xff]   ;;  %p2296_p3 = por %p2295_p2, %p2294_p1 }
  0x53   :  { %v2251_v63 = vld [vmem:[%s2784_s0 + $0xf0] sm:$0xff]   ;;  %v2252_v0 = vld [vmem:[%s2784_s0 + $0xf8] sm:$0xff]   ;;  %v2255_v1 = vld [vmem:[%s2784_s0 + $0x100] sm:$0xff]  }
  0x54   :  { %2136 = vmatmul.mubr.msk.bf16.gmra.mxu1 %vm490_vm2, %v2262_v45  ;;  %v2256_v2 = vld [vmem:[%s2784_s0 + $0x108] sm:$0xff]   ;;  %v2259_v3 = vld [vmem:[%s2784_s0 + $0x110] sm:$0xff]   ;;  %v2260_v4 = vld [vmem:[%s2784_s0 + $0x118] sm:$0xff]   ;;  %p2297_p4 = pnand %p2296_p3, %p2290_p0 }
  0x55   :  { %2139 = vmatprep.mubr.msk.bf16.mxu1 %vm490_vm2, %v2265_v46  ;;  %v2263_v5 = vld [vmem:[%s2784_s0 + $0x120] sm:$0xff]   ;;  %v2264_v6 = vld [vmem:[%s2784_s0 + $0x128] sm:$0xff]   ;;  %v2273_v7 = vld [vmem:[%s2786_s2 + $0x38] sm:$0xff]  }
  0x56   :  { %2156 = vmatpush3.bf16.msra.mxu1 %v2273_v7 }
  0x57   :  { %2157 = vmatprep.subr.bf16.mxu1 %v2334_v8 }
  0x59   :  { %2064 = vmatmul.mubr.msk.bf16.gmra.mxu0 %vm490_vm2, %v2228_v43 }
  0x5a   :  { %2067 = vmatprep.mubr.msk.bf16.mxu0 %vm490_vm2, %v2231_v44 }
  0x5c   :  { %2140 = vmatmul.mubr.msk.bf16.gmra.mxu1 %vm490_vm2, %v2266_v49 }
  0x5d   :  { %2143 = vmatprep.mubr.msk.bf16.mxu1 %vm490_vm2, %v2267_v50 }
  0x61   :  { %2068 = vmatmul.mubr.msk.bf16.gmra.mxu0 %vm490_vm2, %v2232_v47  ;;  %v2274_v47 = vld [vmem:[%s2786_s2 + $0x30] sm:$0xff]  }
  0x62   :  { %2071 = vmatprep.mubr.msk.bf16.mxu0 %vm490_vm2, %v2235_v48  ;;  %2158 = vmatpush3.bf16.msra.mxu1 %v2274_v47 }
  0x63   :  { %2159 = vmatprep.subr.bf16.mxu1 %v2334_v8 }
  0x64   :  { %2144 = vmatmul.mubr.msk.bf16.gmra.mxu1 %vm490_vm2, %v2268_v53 }
  0x65   :  { %2147 = vmatprep.mubr.msk.bf16.mxu1 %vm490_vm2, %v2269_v54 }
  0x69   :  { %2072 = vmatmul.mubr.msk.bf16.gmra.mxu0 %vm490_vm2, %v2236_v51 }
  0x6a   :  { %2075 = vmatprep.mubr.msk.bf16.mxu0 %vm490_vm2, %v2239_v52  ;;  %v2275_v52 = vld [vmem:[%s2786_s2 + $0x28] sm:$0xff]  }
  0x6b   :  { %2160 = vmatpush3.bf16.msra.mxu1 %v2275_v52 }
  0x6c   :  { %2148 = vmatmul.mubr.msk.bf16.gmra.mxu1 %vm490_vm2, %v2270_v57  ;;  %2161 = vmatprep.subr.bf16.mxu1 %v2334_v8 }
  0x6d   :  { %2151 = vmatprep.mubr.msk.bf16.mxu1 %vm490_vm2, %v2271_v58 }
  0x71   :  { %2076 = vmatmul.mubr.msk.bf16.gmra.mxu0 %vm490_vm2, %v2240_v55 }
  0x72   :  { %2079 = vmatprep.mubr.msk.bf16.mxu0 %vm490_vm2, %v2243_v56 }
  0x74   :  { %2152 = vmatmul.mubr.msk.bf16.gmra.mxu1 %vm490_vm2, %v2272_v61 }
  0x75   :  { %2171 = vmatprep.mubr.msk.bf16.mxu1 %vm2335_vm3, %v2334_v8 }
  0x79   :  { %2080 = vmatmul.mubr.msk.bf16.gmra.mxu0 %vm490_vm2, %v2244_v59 }
  0x7a   :  { %2083 = vmatprep.mubr.msk.bf16.mxu0 %vm490_vm2, %v2247_v60 }
  0x81   :  { %2084 = vmatmul.mubr.msk.bf16.gmra.mxu0 %vm490_vm2, %v2248_v62 }
  0x82   :  { %2087 = vmatprep.mubr.msk.bf16.mxu0 %vm490_vm2, %v2251_v63 }
  0x89   :  { %2088 = vmatmul.mubr.msk.bf16.gmra.mxu0 %vm490_vm2, %v2252_v0 }
  0x8a   :  { %2091 = vmatprep.mubr.msk.bf16.mxu0 %vm490_vm2, %v2255_v1 }
  0x91   :  { %2092 = vmatmul.mubr.msk.bf16.gmra.mxu0 %vm490_vm2, %v2256_v2 }
  0x92   :  { %2095 = vmatprep.mubr.msk.bf16.mxu0 %vm490_vm2, %v2259_v3 }
  0x99   :  { %2096 = vmatmul.mubr.msk.bf16.gmra.mxu0 %vm490_vm2, %v2260_v4 }
  0x9a   :  { %2099 = vmatprep.mubr.msk.bf16.mxu0 %vm490_vm2, %v2263_v5 }
  0xa1   :  { %2100 = vmatmul.mubr.msk.bf16.gmra.mxu0 %vm490_vm2, %v2264_v6 }
  0xd1   :  { %v2029_v9 = vpop.f32.mrf.mxu0  ;;  %v2639_v18 = vpop.f32.mrf.mxu1 }
  0xd2   :  { %v1237_v16 = vmax.f32 %v2029_v9, 0.0 }
  0xd3   :  { %v724_v10 = vpop.f32.mrf.mxu0  ;;  %v2641_v22 = vpop.f32.mrf.mxu1 }
  0xd4   :  { %v1235_v13 = vmax.f32 %v724_v10, 0.0 }
  0xd5   :  { %v2030_v11 = vpop.f32.mrf.mxu0  ;;  %v2643_v26 = vpop.f32.mrf.mxu1 }
  0xd6   :  { %v1238_v20 = vmax.f32 %v2030_v11, 0.0 }
  0xd7   :  { %v727_v12 = vpop.f32.mrf.mxu0  ;;  %v2645_v30 = vpop.f32.mrf.mxu1 }
  0xd8   :  { %v1236_v14 = vmax.f32 %v727_v12, 0.0 }
  0xd9   :  { %v2033_v15 = vpop.f32.mrf.mxu0  ;;  %v2647_v34 = vpop.f32.mrf.mxu1 }
  0xda   :  { %v1363_v17 = vadd.f32 %v1236_v14, %v1235_v13  ;;  %v1241_v32 = vmax.f32 %v2033_v15, 0.0 }
  0xdb   :  { %v740_v19 = vpop.f32.mrf.mxu0  ;;  %v2649_v38 = vpop.f32.mrf.mxu1 }
  0xdc   :  { %v1364_v21 = vadd.f32 %v1363_v17, %v1237_v16  ;;  %v1239_v24 = vmax.f32 %v740_v19, 0.0 }
  0xdd   :  { %v2034_v23 = vpop.f32.mrf.mxu0  ;;  %v2651_v42 = vpop.f32.mrf.mxu1 }
  0xde   :  { %v1365_v25 = vadd.f32 %v1364_v21, %v1238_v20  ;;  %v1242_v36 = vmax.f32 %v2034_v23, 0.0 }
  0xdf   :  { %v743_v27 = vpop.f32.mrf.mxu0  ;;  %v2653_v46 = vpop.f32.mrf.mxu1 }
  0xe0   :  { %v1366_v28 = vadd.f32 %v1365_v25, %v1239_v24  ;;  %v1240_v29 = vmax.f32 %v743_v27, 0.0 }
  0xe1   :  { %v2037_v31 = vpop.f32.mrf.mxu0  ;;  %v2658_v51 = vpop.f32.mrf.mxu1 }
  0xe2   :  { %v1367_v33 = vadd.f32 %v1366_v28, %v1240_v29  ;;  %v1245_v49 = vmax.f32 %v2037_v31, 0.0 }
  0xe3   :  { %v756_v35 = vpop.f32.mrf.mxu0  ;;  %v2664_v56 = vpop.f32.mrf.mxu1 }
  0xe4   :  { %v1368_v37 = vadd.f32 %v1367_v33, %v1241_v32  ;;  %v1243_v40 = vmax.f32 %v756_v35, 0.0 }
  0xe5   :  { %v2038_v39 = vpop.f32.mrf.mxu0  ;;  %v2666_v60 = vpop.f32.mrf.mxu1 }
  0xe6   :  { %v1369_v41 = vadd.f32 %v1368_v37, %v1242_v36  ;;  %v1246_v54 = vmax.f32 %v2038_v39, 0.0 }
  0xe7   :  { %v759_v43 = vpop.f32.mrf.mxu0  ;;  %v2669_v0 = vpop.f32.mrf.mxu1 }
  0xe8   :  { %v1370_v44 = vadd.f32 %v1369_v41, %v1243_v40  ;;  %v1244_v45 = vmax.f32 %v759_v43, 0.0 }
  0xe9   :  { %v2041_v48 = vpop.f32.mrf.mxu0  ;;  %v2671_v4 = vpop.f32.mrf.mxu1 }
  0xea   :  { %v1371_v50 = vadd.f32 %v1370_v44, %v1244_v45  ;;  %v1249_v2 = vmax.f32 %v2041_v48, 0.0 }
  0xeb   :  { %v772_v53 = vpop.f32.mrf.mxu0  ;;  %v2673_v9 = vpop.f32.mrf.mxu1 }
  0xec   :  { %v1372_v55 = vadd.f32 %v1371_v50, %v1245_v49  ;;  %v1247_v58 = vmax.f32 %v772_v53, 0.0 }
  0xed   :  { %v2042_v57 = vpop.f32.mrf.mxu0  ;;  %v2675_v13 = vpop.f32.mrf.mxu1 }
  0xee   :  { %v1373_v59 = vadd.f32 %v1372_v55, %v1246_v54  ;;  %v1250_v6 = vmax.f32 %v2042_v57, 0.0 }
  0xef   :  { %v775_v61 = vpop.f32.mrf.mxu0  ;;  %v2677_v17 = vpop.f32.mrf.mxu1 }
  0xf0   :  { %v1374_v62 = vadd.f32 %v1373_v59, %v1247_v58  ;;  %v1248_v63 = vmax.f32 %v775_v61, 0.0 }
  0xf1   :  { %v2045_v1 = vpop.f32.mrf.mxu0  ;;  %v2679_v23 = vpop.f32.mrf.mxu1 }
  0xf2   :  { %v1375_v3 = vadd.f32 %v1374_v62, %v1248_v63  ;;  %v1253_v20 = vmax.f32 %v2045_v1, 0.0 }
  0xf3   :  { %v788_v5 = vpop.f32.mrf.mxu0  ;;  %v2681_v28 = vpop.f32.mrf.mxu1 }
  0xf4   :  { %v1376_v7 = vadd.f32 %v1375_v3, %v1249_v2  ;;  %v1251_v11 = vmax.f32 %v788_v5, 0.0 }
  0xf5   :  { %v2046_v10 = vpop.f32.mrf.mxu0  ;;  %v2683_v33 = vpop.f32.mrf.mxu1 }
  0xf6   :  { %v1377_v12 = vadd.f32 %v1376_v7, %v1250_v6  ;;  %v1254_v25 = vmax.f32 %v2046_v10, 0.0  ;;  %v2276_v10 = vld [vmem:[%s2786_s2 + $0x20] sm:$0xff]  }
  0xf7   :  { %v791_v14 = vpop.f32.mrf.mxu0  ;;  %v2685_v39 = vpop.f32.mrf.mxu1  ;;  %2162 = vmatpush3.bf16.msra.mxu1 %v2276_v10 }
  0xf8   :  { %v1378_v15 = vadd.f32 %v1377_v12, %v1251_v11  ;;  %v1252_v16 = vmax.f32 %v791_v14, 0.0  ;;  %2163 = vmatprep.subr.bf16.mxu1 %v2334_v8 }
  0xf9   :  { %v2049_v19 = vpop.f32.mrf.mxu0  ;;  %v2125_v44 = vpop.f32.mrf.mxu1 }
  0xfa   :  { %v1379_v21 = vadd.f32 %v1378_v15, %v1252_v16  ;;  %v1257_v41 = vmax.f32 %v2049_v19, 0.0  ;;  %v1333_v12 = vmax.f32 %v2125_v44, 0.0 }
  0xfb   :  { %v804_v24 = vpop.f32.mrf.mxu0  ;;  %v1108_v49 = vpop.f32.mrf.mxu1 }
  0xfc   :  { %v1380_v27 = vadd.f32 %v1379_v21, %v1253_v20  ;;  %v1255_v31 = vmax.f32 %v804_v24, 0.0  ;;  %v1331_v62 = vmax.f32 %v1108_v49, 0.0  ;;  %v2277_v20 = vld [vmem:[%s2786_s2 + $0x18] sm:$0xff]  }
  0xfd   :  { %v2050_v29 = vpop.f32.mrf.mxu0  ;;  %v2126_v54 = vpop.f32.mrf.mxu1  ;;  %2164 = vmatpush3.bf16.msra.mxu1 %v2277_v20 }
  0xfe   :  { %v1381_v32 = vadd.f32 %v1380_v27, %v1254_v25  ;;  %v1258_v47 = vmax.f32 %v2050_v29, 0.0  ;;  %v1334_v29 = vmax.f32 %v2126_v54, 0.0  ;;  %2165 = vmatprep.subr.bf16.mxu1 %v2334_v8 }
  0xff   :  { %v807_v35 = vpop.f32.mrf.mxu0  ;;  %v1111_v59 = vpop.f32.mrf.mxu1 }
 0x100   :  { %v1382_v36 = vadd.f32 %v1381_v32, %v1255_v31  ;;  %v1256_v37 = vmax.f32 %v807_v35, 0.0  ;;  %v1332_v63 = vmax.f32 %v1111_v59, 0.0 }
 0x101   :  { %v2053_v40 = vpop.f32.mrf.mxu0  ;;  %v2687_v3 = vpop.f32.mrf.mxu1 }
 0x102   :  { %v1383_v43 = vadd.f32 %v1382_v36, %v1256_v37  ;;  %v1261_v1 = vmax.f32 %v2053_v40, 0.0  ;;  %v1474_v14 = vadd.f32 %v1332_v63, %v1331_v62  ;;  %v2278_v37 = vld [vmem:[%s2786_s2 + $0x10] sm:$0xff]   ;;  %v2280_v63 = vld [vmem:[%s2786_s2] sm:$0xff]  }
 0x103   :  { %v820_v45 = vpop.f32.mrf.mxu0  ;;  %v1124_v19 = vpop.f32.mrf.mxu1  ;;  %2166 = vmatpush3.bf16.msra.mxu1 %v2278_v37 }
 0x104   :  { %v1384_v48 = vadd.f32 %v1383_v43, %v1257_v41  ;;  %v1259_v52 = vmax.f32 %v820_v45, 0.0  ;;  %v1475_v31 = vadd.f32 %v1474_v14, %v1333_v12  ;;  %v1335_v45 = vmax.f32 %v1124_v19, 0.0  ;;  %2167 = vmatprep.subr.bf16.mxu1 %v2334_v8 }
 0x105   :  { %v2054_v50 = vpop.f32.mrf.mxu0  ;;  %v2130_v36 = vpop.f32.mrf.mxu1 }
 0x106   :  { %v1385_v53 = vadd.f32 %v1384_v48, %v1258_v47  ;;  %v1262_v6 = vmax.f32 %v2054_v50, 0.0  ;;  %v1476_v47 = vadd.f32 %v1475_v31, %v1334_v29  ;;  %v2279_v50 = vld [vmem:[%s2786_s2 + $0x8] sm:$0xff]  }
 0x107   :  { %v823_v55 = vpop.f32.mrf.mxu0  ;;  %v1127_v49 = vpop.f32.mrf.mxu1  ;;  %2168 = vmatpush3.bf16.msra.mxu1 %v2279_v50 }
 0x108   :  { %v1386_v57 = vadd.f32 %v1385_v53, %v1259_v52  ;;  %v1260_v58 = vmax.f32 %v823_v55, 0.0  ;;  %2169 = vmatprep.subr.bf16.mxu1 %v2334_v8 }
 0x109   :  { %v2057_v61 = vpop.f32.mrf.mxu0 }
 0x10a   :  { %v1387_v2 = vadd.f32 %v1386_v57, %v1260_v58  ;;  %v1265_v32 = vmax.f32 %v2057_v61, 0.0  ;;  %v1477_v57 = vadd.f32 %v1476_v47, %v1335_v45  ;;  %v1336_v58 = vmax.f32 %v1127_v49, 0.0 }
 0x10b   :  { %v836_v5 = vpop.f32.mrf.mxu0  ;;  %2170 = vmatpush3.bf16.msra.mxu1 %v2280_v63 }
 0x10c   :  { %v1388_v7 = vadd.f32 %v1387_v2, %v1261_v1  ;;  %v1263_v15 = vmax.f32 %v836_v5, 0.0  ;;  %v2133_v62 = vpop.f32.mrf.mxu1  ;;  %v1478_v10 = vadd.f32 %v1477_v57, %v1336_v58  ;;  %2175 = vmatprep.subr.bf16.mxu1 %v2334_v8 }
 0x10d   :  { %v2058_v11 = vpop.f32.mrf.mxu0  ;;  %v1341_v63 = vmax.f32 %v2133_v62, 0.0 }
 0x10e   :  { %v1389_v16 = vadd.f32 %v1388_v7, %v1262_v6  ;;  %v1266_v41 = vmax.f32 %v2058_v11, 0.0  ;;  %v1337_v7 = vmax.f32 %v2687_v3, 0.0  ;;  %v1140_v14 = vpop.f32.mrf.mxu1 }
 0x10f   :  { %v839_v21 = vpop.f32.mrf.mxu0  ;;  %v1339_v37 = vmax.f32 %v1140_v14, 0.0 }
 0x110   :  { %v1390_v24 = vadd.f32 %v1389_v16, %v1263_v15  ;;  %v1264_v25 = vmax.f32 %v839_v21, 0.0  ;;  %v1338_v21 = vmax.f32 %v2130_v36, 0.0  ;;  %v2134_v29 = vpop.f32.mrf.mxu1 }
 0x111   :  { %v2061_v27 = vpop.f32.mrf.mxu0  ;;  %v1342_v14 = vmax.f32 %v2134_v29, 0.0 }
 0x112   :  { %v1391_v35 = vadd.f32 %v1390_v24, %v1264_v25  ;;  %v1269_v59 = vmax.f32 %v2061_v27, 0.0  ;;  %v1479_v24 = vadd.f32 %v1478_v10, %v1337_v7 }
 0x113   :  { %v852_v40 = vpop.f32.mrf.mxu0 }
 0x114   :  { %v1392_v43 = vadd.f32 %v1391_v35, %v1265_v32  ;;  %v1267_v53 = vmax.f32 %v852_v40, 0.0  ;;  %v1480_v40 = vadd.f32 %v1479_v24, %v1338_v21 }
 0x115   :  { %v2062_v44 = vpop.f32.mrf.mxu0 }
 0x116   :  { %v2702_v48 = vadd.f32 %v1392_v43, %v1266_v41  ;;  %v1270_v2 = vmax.f32 %v2062_v44, 0.0  ;;  %v1143_v44 = vpop.f32.mrf.mxu1 }
 0x117   :  { %v855_v52 = vpop.f32.mrf.mxu0 }
 0x118   :  { %v1268_v54 = vmax.f32 %v855_v52, 0.0  ;;  %v1481_v52 = vadd.f32 %v1480_v40, %v1339_v37 }
 0x119   :  { %v2065_v55 = vpop.f32.mrf.mxu0 }
 0x11a   :  { %v1400_v61 = vadd.f32 %v1268_v54, %v1267_v53  ;;  %v1273_v25 = vmax.f32 %v2065_v55, 0.0  ;;  %v1340_v53 = vmax.f32 %v1143_v44, 0.0  ;;  %v2137_v55 = vpop.f32.mrf.mxu1 }
 0x11b   :  { %v868_v1 = vpop.f32.mrf.mxu0 }
 0x11c   :  { %v1401_v5 = vadd.f32 %v1400_v61, %v1269_v59  ;;  %v1271_v11 = vmax.f32 %v868_v1, 0.0  ;;  %v1482_v1 = vadd.f32 %v1481_v52, %v1340_v53 }
 0x11d   :  { %v2066_v6 = vpop.f32.mrf.mxu0 }
 0x11e   :  { %v1402_v12 = vadd.f32 %v1401_v5, %v1270_v2  ;;  %v1274_v32 = vmax.f32 %v2066_v6, 0.0  ;;  %v1156_v6 = vpop.f32.mrf.mxu1 }
 0x11f   :  { %v871_v15 = vpop.f32.mrf.mxu0 }
 0x120   :  { %v1403_v16 = vadd.f32 %v1402_v12, %v1271_v11  ;;  %v1272_v19 = vmax.f32 %v871_v15, 0.0  ;;  %v1483_v15 = vadd.f32 %v1482_v1, %v1341_v63 }
 0x121   :  { %v2069_v20 = vpop.f32.mrf.mxu0 }
 0x122   :  { %v1404_v27 = vadd.f32 %v1403_v16, %v1272_v19  ;;  %v1277_v36 = vmax.f32 %v2069_v20, 0.0  ;;  %v2138_v20 = vpop.f32.mrf.mxu1 }
 0x123   :  { %v884_v31 = vpop.f32.mrf.mxu0 }
 0x124   :  { %v1405_v35 = vadd.f32 %v1404_v27, %v1273_v25  ;;  %v1275_v41 = vmax.f32 %v884_v31, 0.0  ;;  %v1343_v31 = vmax.f32 %v1156_v6, 0.0  ;;  %v1346_v6 = vmax.f32 %v2138_v20, 0.0 }
 0x125   :  { %v2070_v3 = vpop.f32.mrf.mxu0 }
 0x126   :  { %v1406_v43 = vadd.f32 %v1405_v35, %v1274_v32  ;;  %v1278_v58 = vmax.f32 %v2070_v3, 0.0  ;;  %v1484_v32 = vadd.f32 %v1483_v15, %v1342_v14  ;;  %v1159_v3 = vpop.f32.mrf.mxu1 }
 0x127   :  { %v887_v45 = vpop.f32.mrf.mxu0 }
 0x128   :  { %v1407_v47 = vadd.f32 %v1406_v43, %v1275_v41  ;;  %v1276_v49 = vmax.f32 %v887_v45, 0.0  ;;  %v1485_v44 = vadd.f32 %v1484_v32, %v1343_v31  ;;  %v1344_v45 = vmax.f32 %v1159_v3, 0.0 }
 0x129   :  { %v2073_v50 = vpop.f32.mrf.mxu0  ;;  %v1394_v32 = vrot.slane %v2702_v48, 4 }
 0x12a   :  { %v1408_v54 = vadd.f32 %v1407_v47, %v1276_v49  ;;  %v1281_v16 = vmax.f32 %v2073_v50, 0.0  ;;  %v2141_v49 = vpop.f32.mrf.mxu1 }
 0x12b   :  { %v900_v57 = vpop.f32.mrf.mxu0 }
 0x12c   :  { %v1409_v59 = vadd.f32 %v1408_v54, %v1277_v36  ;;  %v1279_v2 = vmax.f32 %v900_v57, 0.0  ;;  %v1345_v54 = vmax.f32 %v2137_v55, 0.0  ;;  %v1486_v57 = vadd.f32 %v1485_v44, %v1344_v45 }
 0x12d   :  { %v2074_v61 = vpop.f32.mrf.mxu0  ;;  %v1395_v45 = vadd.f32 %v1394_v32, %v2702_v48 }
 0x12e   :  { %v1410_v5 = vadd.f32 %v1409_v59, %v1278_v58  ;;  %v1282_v24 = vmax.f32 %v2074_v61, 0.0  ;;  %v1172_v61 = vpop.f32.mrf.mxu1 }
 0x12f   :  { %v903_v7 = vpop.f32.mrf.mxu0 }
 0x130   :  { %v1411_v10 = vadd.f32 %v1410_v5, %v1279_v2  ;;  %v1280_v11 = vmax.f32 %v903_v7, 0.0  ;;  %v1487_v7 = vadd.f32 %v1486_v57, %v1345_v54 }
 0x131   :  { %v2077_v12 = vpop.f32.mrf.mxu0 }
 0x132   :  { %v1412_v19 = vadd.f32 %v1411_v10, %v1280_v11  ;;  %v1285_v29 = vmax.f32 %v2077_v12, 0.0  ;;  %v2142_v12 = vpop.f32.mrf.mxu1 }
 0x133   :  { %v916_v21 = vpop.f32.mrf.mxu0 }
 0x134   :  { %v1413_v25 = vadd.f32 %v1412_v19, %v1281_v16  ;;  %v1283_v62 = vmax.f32 %v916_v21, 0.0  ;;  %v1347_v21 = vmax.f32 %v1172_v61, 0.0 }
 0x135   :  { %v2078_v27 = vpop.f32.mrf.mxu0 }
 0x136   :  { %v1414_v35 = vadd.f32 %v1413_v25, %v1282_v24  ;;  %v1286_v52 = vmax.f32 %v2078_v27, 0.0  ;;  %v1488_v24 = vadd.f32 %v1487_v7, %v1346_v6  ;;  %v1175_v27 = vpop.f32.mrf.mxu1 }
 0x137   :  { %v919_v37 = vpop.f32.mrf.mxu0 }
 0x138   :  { %v1415_v40 = vadd.f32 %v1414_v35, %v1283_v62  ;;  %v1284_v41 = vmax.f32 %v919_v37, 0.0  ;;  %v1489_v20 = vadd.f32 %v1488_v24, %v1347_v21  ;;  %v1348_v37 = vmax.f32 %v1175_v27, 0.0 }
 0x139   :  { %v2081_v43 = vpop.f32.mrf.mxu0 }
 0x13a   :  { %v1416_v47 = vadd.f32 %v1415_v40, %v1284_v41  ;;  %v1289_v10 = vmax.f32 %v2081_v43, 0.0  ;;  %v2145_v43 = vpop.f32.mrf.mxu1 }
 0x13b   :  { %v932_v50 = vpop.f32.mrf.mxu0 }
 0x13c   :  { %v1417_v53 = vadd.f32 %v1416_v47, %v1285_v29  ;;  %v1287_v58 = vmax.f32 %v932_v50, 0.0  ;;  %v1188_v57 = vpop.f32.mrf.mxu1 }
 0x13d   :  { %v2082_v36 = vpop.f32.mrf.mxu0 }
 0x13e   :  { %v1418_v59 = vadd.f32 %v1417_v53, %v1286_v52  ;;  %v1290_v15 = vmax.f32 %v2082_v36, 0.0  ;;  %v1349_v52 = vmax.f32 %v2141_v49, 0.0  ;;  %v1490_v53 = vadd.f32 %v1489_v20, %v1348_v37 }
 0x13f   :  { %v935_v63 = vpop.f32.mrf.mxu0  ;;  %v1351_v49 = vmax.f32 %v1188_v57, 0.0 }
 0x140   :  { %v1419_v1 = vadd.f32 %v1418_v59, %v1287_v58  ;;  %v1288_v2 = vmax.f32 %v935_v63, 0.0  ;;  %v1396_v59 = vrot.slane %v1395_v45, 2 }
 0x141   :  { %v2085_v5 = vpop.f32.mrf.mxu0 }
 0x142   :  { %v1420_v11 = vadd.f32 %v1419_v1, %v1288_v2  ;;  %v1293_v40 = vmax.f32 %v2085_v5, 0.0  ;;  %v1350_v2 = vmax.f32 %v2142_v12, 0.0  ;;  %v1491_v5 = vadd.f32 %v1490_v53, %v1349_v52 }
 0x143   :  { %v948_v14 = vpop.f32.mrf.mxu0  ;;  %v1397_v48 = vadd.f32 %v1396_v59, %v1395_v45  ;;  %v1353_v52 = vmax.f32 %v2145_v43, 0.0 }
 0x144   :  { %v1421_v16 = vadd.f32 %v1420_v11, %v1289_v10  ;;  %v1291_v55 = vmax.f32 %v948_v14, 0.0  ;;  %v2146_v10 = vpop.f32.mrf.mxu1 }
 0x145   :  { %v2086_v19 = vpop.f32.mrf.mxu0 }
 0x146   :  { %v1422_v25 = vadd.f32 %v1421_v16, %v1290_v15  ;;  %v1294_v29 = vmax.f32 %v2086_v19, 0.0  ;;  %v1492_v19 = vadd.f32 %v1491_v5, %v1350_v2  ;;  %v1191_v24 = vpop.f32.mrf.mxu1 }
 0x147   :  { %v951_v31 = vpop.f32.mrf.mxu0 }
 0x148   :  { %v1423_v62 = vadd.f32 %v1422_v25, %v1291_v55  ;;  %v1292_v35 = vmax.f32 %v951_v31, 0.0  ;;  %v1398_v25 = vrot.slane %v1397_v48, 1  ;;  %v1493_v12 = vadd.f32 %v1492_v19, %v1351_v49 }
 0x149   :  { %v2089_v3 = vpop.f32.mrf.mxu0 }
 0x14a   :  { %v1424_v41 = vadd.f32 %v1423_v62, %v1292_v35  ;;  %v1297_v6 = vmax.f32 %v2089_v3, 0.0  ;;  %v1352_v35 = vmax.f32 %v1191_v24, 0.0 }
 0x14b   :  { %v964_v44 = vpop.f32.mrf.mxu0 }
 0x14c   :  { %v1425_v47 = vadd.f32 %v1424_v41, %v1293_v40  ;;  %v1295_v36 = vmax.f32 %v964_v44, 0.0  ;;  %v2149_v40 = vpop.f32.mrf.mxu1  ;;  %v1399_v44 = vadd.f32 %v1398_v25, %v1397_v48  ;;  %v1494_v53 = vadd.f32 %v1493_v12, %v1352_v35 }
 0x14d   :  { %v2090_v50 = vpop.f32.mrf.mxu0 }
 0x14e   :  { %v1426_v54 = vadd.f32 %v1425_v47, %v1294_v29  ;;  %v1298_v14 = vmax.f32 %v2090_v50, 0.0 }
 0x14f   :  { %v967_v58 = vpop.f32.mrf.mxu0 }
 0x150   :  { %v1427_v61 = vadd.f32 %v1426_v54, %v1295_v36  ;;  %v1296_v63 = vmax.f32 %v967_v58, 0.0  ;;  %v1204_v58 = vpop.f32.mrf.mxu1 }
 0x151   :  { %v2093_v1 = vpop.f32.mrf.mxu0 }
 0x152   :  { %v1428_v7 = vadd.f32 %v1427_v61, %v1296_v63  ;;  %v1301_v20 = vmax.f32 %v2093_v1, 0.0  ;;  %v1511_v61 = vmul.f32 0.00390625, %v1399_v44 }
 0x153   :  { %v980_v11 = vpop.f32.mrf.mxu0 }
 0x154   :  { %v1429_v15 = vadd.f32 %v1428_v7, %v1297_v6  ;;  %v1299_v31 = vmax.f32 %v980_v11, 0.0  ;;  %v1354_v6 = vmax.f32 %v2146_v10, 0.0  ;;  %v1495_v7 = vadd.f32 %v1494_v53, %v1353_v52 }
 0x155   :  { %v2094_v16 = vpop.f32.mrf.mxu0  ;;  %v1527_v43 = vpack.c.bf16 %v1511_v61, %v1511_v61 }
 0x156   :  { %v1430_v21 = vadd.f32 %v1429_v15, %v1298_v14  ;;  %v1302_v29 = vmax.f32 %v2094_v16, 0.0  ;;  %v2150_v15 = vpop.f32.mrf.mxu1  ;;  %v1496_v25 = vadd.f32 %v1495_v7, %v1354_v6 }
 0x157   :  { %v983_v55 = vpop.f32.mrf.mxu0 }
 0x158   :  { %v1431_v27 = vrot.slane %v1430_v21, 4  ;;  %v1300_v32 = vmax.f32 %v983_v55, 0.0  ;;  %v1355_v55 = vmax.f32 %v1204_v58, 0.0  ;;  %v1207_v12 = vpop.f32.mrf.mxu1 }
 0x159   :  { %v2097_v62 = vpop.f32.mrf.mxu0  ;;  %v1356_v44 = vmax.f32 %v1207_v12, 0.0 }
 0x15a   :  { %v1432_v3 = vadd.f32 %v1431_v27, %v1430_v21  ;;  %v1437_v37 = vadd.f32 %v1300_v32, %v1299_v31  ;;  %v1305_v48 = vmax.f32 %v2097_v62, 0.0  ;;  %v1551_v62 = vunpack.c.l.b16 %v1527_v43 }
 0x15b   :  { %v996_v41 = vpop.f32.mrf.mxu0 }
 0x15c   :  { %v1433_v45 = vrot.slane %v1432_v3, 2  ;;  %v1438_v47 = vadd.f32 %v1437_v37, %v1301_v20  ;;  %v1303_v54 = vmax.f32 %v996_v41, 0.0  ;;  %v1497_v41 = vadd.f32 %v1496_v25, %v1355_v55 }
 0x15d   :  { %v2098_v50 = vpop.f32.mrf.mxu0 }
 0x15e   :  { %v1434_v36 = vadd.f32 %v1433_v45, %v1432_v3  ;;  %v1439_v57 = vadd.f32 %v1438_v47, %v1302_v29  ;;  %v1306_v19 = vmax.f32 %v2098_v50, 0.0  ;;  %v2153_v47 = vpop.f32.mrf.mxu1 }
 0x15f   :  { %v999_v59 = vpop.f32.mrf.mxu0  ;;  %v1361_v25 = vmax.f32 %v2153_v47, 0.0 }
 0x160   :  { %v1435_v63 = vrot.slane %v1434_v36, 1  ;;  %v1440_v2 = vadd.f32 %v1439_v57, %v1303_v54  ;;  %v1304_v5 = vmax.f32 %v999_v59, 0.0  ;;  %v1498_v54 = vadd.f32 %v1497_v41, %v1356_v44  ;;  %v1220_v59 = vpop.f32.mrf.mxu1 }
 0x161   :  { %v2101_v1 = vpop.f32.mrf.mxu0  ;;  %v1311_v57 = vmax.f32 %v2641_v22, 0.0  ;;  %v1324_v41 = vmax.f32 %v2677_v17, 0.0  ;;  %v1330_v17 = vmax.f32 %v2683_v33, 0.0 }
 0x162   :  { %v1436_v11 = vadd.f32 %v1435_v63, %v1434_v36  ;;  %v1441_v14 = vadd.f32 %v1440_v2, %v1304_v5  ;;  %v1309_v45 = vmax.f32 %v2101_v1, 0.0  ;;  %v1357_v36 = vmax.f32 %v2149_v40, 0.0  ;;  %v2154_v7 = vpop.f32.mrf.mxu1 }
 0x163   :  { %v1012_v16 = vpop.f32.mrf.mxu0  ;;  %v1358_v2 = vmax.f32 %v2150_v15, 0.0  ;;  %v1313_v1 = vmax.f32 %v2639_v18, 0.0  ;;  %v1315_v40 = vmax.f32 %v2649_v38, 0.0  ;;  %v1317_v15 = vmax.f32 %v2647_v34, 0.0 }
 0x164   :  { %v1512_v49 = vmul.f32 0.00390625, %v1436_v11  ;;  %v1442_v21 = vadd.f32 %v1441_v14, %v1305_v48  ;;  %v1307_v31 = vmax.f32 %v1012_v16, 0.0  ;;  %v1499_v5 = vadd.f32 %v1498_v54, %v1357_v36  ;;  %v1223_v22 = vpop.f32.mrf.mxu1 }
 0x165   :  { %v2102_v24 = vpop.f32.mrf.mxu0  ;;  %v1314_v11 = vmax.f32 %v2643_v26, 0.0  ;;  %v1359_v14 = vmax.f32 %v1220_v59, 0.0  ;;  %v1318_v18 = vmax.f32 %v2651_v42, 0.0  ;;  %v1320_v38 = vmax.f32 %v2669_v0, 0.0 }
 0x166   :  { %v1528_v27 = vpack.c.bf16 %v1512_v49, %v1512_v49  ;;  %v1443_v32 = vadd.f32 %v1442_v21, %v1306_v19  ;;  %v2717_v10 = vsel %vm1519_vm4, %v1512_v49, %v1511_v61  ;;  %v1310_v52 = vmax.f32 %v2102_v24, 0.0 }
 0x167   :  { %v1015_v35 = vpop.f32.mrf.mxu0  ;;  %v1312_v61 = vmax.f32 %v2645_v30, 0.0  ;;  %v1500_v16 = vadd.f32 %v1499_v5, %v1358_v2  ;;  %v1316_v49 = vmax.f32 %v2653_v46, 0.0  ;;  %v1360_v21 = vmax.f32 %v1223_v22, 0.0  ;;  %v2281_v22 = vld [vmem:[%s2787_s3 + $0x38] sm:$0xff]  }
 0x168   :  { %v1552_v3 = vunpack.c.l.b16 %v1528_v27  ;;  %v1444_v20 = vadd.f32 %v1443_v32, %v1307_v31  ;;  %v1308_v37 = vmax.f32 %v1015_v35, 0.0  ;;  %v1319_v27 = vmax.f32 %v2664_v56, 0.0 }
 0x169   :  { %v1501_v30 = vadd.f32 %v1500_v16, %v1359_v14  ;;  %v1362_v12 = vmax.f32 %v2154_v7, 0.0  ;;  %v1321_v46 = vmax.f32 %v2658_v51, 0.0  ;;  %v1323_v42 = vmax.f32 %v2673_v9, 0.0 }
 0x16a   :  { %v1445_v29 = vadd.f32 %v1444_v20, %v1308_v37  ;;  %v2720_v50 = vsel %vm1519_vm4, %v1552_v3, %v1551_v62  ;;  %v1322_v3 = vmax.f32 %v2666_v60, 0.0  ;;  %v1327_v51 = vmax.f32 %v2681_v28, 0.0 }
 0x16b   :  { %v1502_v26 = vadd.f32 %v1501_v30, %v1360_v21  ;;  %v1328_v60 = vmax.f32 %v2685_v39, 0.0  ;;  %v1329_v9 = vmax.f32 %v2679_v23, 0.0  ;;  %v2285_v30 = vld [vmem:[%s2787_s3 + $0x18] sm:$0xff]   ;;  %v2286_v21 = vld [vmem:[%s2787_s3 + $0x10] sm:$0xff]  }
 0x16c   :  { %v1446_v53 = vadd.f32 %v1445_v29, %v1309_v45  ;;  %v1325_v45 = vmax.f32 %v2671_v4, 0.0  ;;  %v1326_v29 = vmax.f32 %v2675_v13, 0.0 }
 0x16d   :  { %v1503_v35 = vadd.f32 %v1502_v26, %v1361_v25 }
 0x16e   :  { %v1447_v58 = vadd.f32 %v1446_v53, %v1310_v52 }
 0x16f   :  { %v1504_v20 = vadd.f32 %v1503_v35, %v1362_v12 }
 0x170   :  { %v1448_v63 = vadd.f32 %v1447_v58, %v1311_v57 }
 0x171   :  { %v1505_v56 = vrot.slane %v1504_v20, 4 }
 0x172   :  { %v1449_v6 = vadd.f32 %v1448_v63, %v1312_v61 }
 0x173   :  { %v1506_v52 = vadd.f32 %v1505_v56, %v1504_v20 }
 0x174   :  { %v1450_v48 = vadd.f32 %v1449_v6, %v1313_v1 }
 0x175   :  { %v1507_v54 = vrot.slane %v1506_v52, 2 }
 0x176   :  { %v1451_v43 = vadd.f32 %v1450_v48, %v1314_v11 }
 0x177   :  { %v1508_v59 = vadd.f32 %v1507_v54, %v1506_v52 }
 0x178   :  { %v1452_v19 = vadd.f32 %v1451_v43, %v1315_v40 }
 0x179   :  { %v1509_v63 = vrot.slane %v1508_v59, 1 }
 0x17a   :  { %v1453_v24 = vadd.f32 %v1452_v19, %v1316_v49  ;;  %v2282_v19 = vld [vmem:[%s2787_s3 + $0x30] sm:$0xff]  }
 0x17b   :  { %v1510_v5 = vadd.f32 %v1509_v63, %v1508_v59 }
 0x17c   :  { %v1454_v55 = vadd.f32 %v1453_v24, %v1317_v15  ;;  %v2287_v15 = vld [vmem:[%s2787_s3 + $0x8] sm:$0xff]   ;;  %v2288_v24 = vld [vmem:[%s2787_s3] sm:$0xff]  }
 0x17d   :  { %v1514_v6 = vmul.f32 0.00390625, %v1510_v5 }
 0x17e   :  { %v1455_v31 = vadd.f32 %v1454_v55, %v1318_v18 }
 0x17f   :  { %v1530_v11 = vpack.c.bf16 %v1514_v6, %v1514_v6 }
 0x180   :  { %v1456_v32 = vadd.f32 %v1455_v31, %v1319_v27 }
 0x181   :  { %v1554_v16 = vunpack.c.l.b16 %v1530_v11 }
 0x182   :  { %v1457_v62 = vadd.f32 %v1456_v32, %v1320_v38 }
 0x184   :  { %v1458_v34 = vadd.f32 %v1457_v62, %v1321_v46 }
 0x186   :  { %v1459_v37 = vadd.f32 %v1458_v34, %v1322_v3 }
 0x188   :  { %v1460_v44 = vadd.f32 %v1459_v37, %v1323_v42 }
 0x18a   :  { %v1461_v0 = vadd.f32 %v1460_v44, %v1324_v41 }
 0x18c   :  { %v1462_v47 = vadd.f32 %v1461_v0, %v1325_v45 }
 0x18e   :  { %v1463_v53 = vadd.f32 %v1462_v47, %v1326_v29 }
 0x190   :  { %v1464_v36 = vadd.f32 %v1463_v53, %v1327_v51 }
 0x192   :  { %v1465_v57 = vadd.f32 %v1464_v36, %v1328_v60 }
 0x194   :  { %v1466_v58 = vadd.f32 %v1465_v57, %v1329_v9 }
 0x196   :  { %v1467_v4 = vadd.f32 %v1466_v58, %v1330_v17 }
 0x198   :  { %v1468_v61 = vrot.slane %v1467_v4, 4 }
 0x19a   :  { %v1469_v13 = vadd.f32 %v1468_v61, %v1467_v4 }
 0x19c   :  { %v1470_v2 = vrot.slane %v1469_v13, 2 }
 0x19e   :  { %v1471_v1 = vadd.f32 %v1470_v2, %v1469_v13 }
 0x1a0   :  { %v1472_v28 = vrot.slane %v1471_v1, 1 }
 0x1a2   :  { %v1473_v7 = vadd.f32 %v1472_v28, %v1471_v1 }
 0x1a4   :  { %v1513_v39 = vmul.f32 0.00390625, %v1473_v7 }
 0x1a6   :  { %v1529_v23 = vpack.c.bf16 %v1513_v39, %v1513_v39  ;;  %v1522_v48 = vsel %vm1521_vm5, %v1513_v39, %v2717_v10  ;;  %v2283_v10 = vld [vmem:[%s2787_s3 + $0x28] sm:$0xff]  }
 0x1a7   :  { %v1524_v33 = vsel %vm1523_vm6, %v1514_v6, %v1522_v48 }
 0x1a8   :  { %v1553_v14 = vunpack.c.l.b16 %v1529_v23  ;;  %1526 = vst [vmem:[#allocation2] sm:$0xf] %v1524_v33 }
 0x1aa   :  { %v1556_v40 = vsel %vm1521_vm5, %v1553_v14, %v2720_v50  ;;  %v2284_v50 = vld [vmem:[%s2787_s3 + $0x20] sm:$0xff]  }
 0x1ab   :  { %v1557_v43 = vsel %vm1523_vm6, %v1554_v16, %v1556_v40 }
 0x1ac   :  { %v1558_v49 = vpack.c.b16 %v1557_v43, %v1557_v43 }
 0x1ae   :  { %2172 = vmatmul.mubr.bf16.vlgmr.msra.gmra.mxu1 %v1558_v49 }
 0x1af   :  { %2176 = vmatpush3.bf16.msra.mxu1 %v2281_v22  ;;  %2191 = vmatprep.mubr.msk.bf16.mxu1 %vm2335_vm3, %v2334_v8 }
 0x1b0   :  { %2177 = vmatprep.subr.bf16.mxu1 %v2334_v8 }
 0x1b3   :  { %2178 = vmatpush3.bf16.msra.mxu1 %v2282_v19 }
 0x1b4   :  { %2179 = vmatprep.subr.bf16.mxu1 %v2334_v8 }
 0x1b7   :  { %2180 = vmatpush3.bf16.msra.mxu1 %v2283_v10 }
 0x1b8   :  { %2181 = vmatprep.subr.bf16.mxu1 %v2334_v8 }
 0x1bb   :  { %2182 = vmatpush3.bf16.msra.mxu1 %v2284_v50 }
 0x1bc   :  { %2183 = vmatprep.subr.bf16.mxu1 %v2334_v8 }
 0x1bf   :  { %2184 = vmatpush3.bf16.msra.mxu1 %v2285_v30 }
 0x1c0   :  { %2185 = vmatprep.subr.bf16.mxu1 %v2334_v8 }
 0x1c3   :  { %2186 = vmatpush3.bf16.msra.mxu1 %v2286_v21 }
 0x1c4   :  { %2187 = vmatprep.subr.bf16.mxu1 %v2334_v8 }
 0x1c7   :  { %2188 = vmatpush3.bf16.msra.mxu1 %v2287_v15 }
 0x1c8   :  { %2189 = vmatprep.subr.bf16.mxu1 %v2334_v8 }
 0x1cb   :  { %2190 = vmatpush3.bf16.msra.mxu1 %v2288_v24 }
 0x26e   :  { %v1642_v18 = vpop.f32.mrf.mxu1 }
 0x26f   :  { %v1648_v55 = vmax.f32 %v1642_v18, 0.0 }
 0x270   :  { %v2173_v25 = vpop.f32.mrf.mxu1 }
 0x271   :  { %v1649_v26 = vpack.c.bf16 %v1648_v55, %v1648_v55 }
 0x272   :  { %v1645_v27 = vpop.f32.mrf.mxu1 }
 0x273   :  { %2192 = vmatmul.mubr.bf16.vlgmr.msra.gmra.mxu1 %v1649_v26 }
 0x274   :  { %v2174_v31 = vpop.f32.mrf.mxu1 }
 0x275   :  { %2300 = shalt.err (!%p2297_p4)
}
 0x276   :  { %1770 = dma.vmem_to_hbm [thread:$0]  %s1768_s26, 64, %s2788_s4, [#allocation3]  }
 0x277   :  { %s2337_s29 = smov [#allocation4]  }
 0x278   :  { %s1777_s1 = sshll.u32 %s2337_s29, 4  ;;  %s1778_s1 = int_to_ptr.vmem [resolvable:$true] %s1777_s1 }
 0x279   :  { %s2309_s30 = scalar_lea.vmem %s1778_s1, 64  ;;  %p2314_p6 = scmp.lt.s32.totalorder %s1778_s1, %s1778_s1 }
 0x27a   :  { %p2310_p5 = scmp.ne.s32.totalorder %s1778_s1, %s2309_s30  ;;  %p2315_p7 = scmp.lt.s32.totalorder %s2309_s30, %s2309_s30 }
 0x27c   :  { %p2316_p8 = por %p2315_p7, %p2314_p6 }
 0x27e   :  { %p2317_p9 = pnand %p2316_p8, %p2310_p5 }
 0x333   :  { %v1748_v8 = vpop.f32.mrf.mxu1 }
 0x334   :  { %v1755_v38 = vrot.slane %v1748_v8, 2  ;;  %v1757_v32 = vrot.slane %v1748_v8, 6 }
 0x335   :  { %v2193_v12 = vpop.f32.mrf.mxu1 }
 0x336   :  { %v1759_v35 = vsel %vm683_vm0, %v1755_v38, %v1757_v32 }
 0x337   :  { %v1751_v46 = vpop.f32.mrf.mxu1  ;;  %1760 = vst [vmem:[#allocation4] sm:$0xf] %v1759_v35 }
 0x338   :  { %2320 = shalt.err (!%p2317_p9)
}
 0x339   :  { %1780 = dma.vmem_to_hbm [thread:$0]  %s1778_s1, 64, %s2789_s5, [#allocation5]   ;;  %v2194_v62 = vpop.f32.mrf.mxu1 }
 0x33a   :  { %2329 = dma.done.wait [#allocation3], 64  }
 0x33b   :  { %2330 = vsyncadd [#allocation3], 4294967232 }
 0x33c   :  { %2331 = dma.done.wait [#allocation5], 64  }
 0x33d   :  { %2332 = vsyncadd [#allocation5], 4294967232 }
 0x33e   :  { %1787 = vsyncpa [#allocation3], 1 }
 0x33f   :  { %1788 = vsyncpa [#allocation5], 1 }

</bundles_post_ra>
